<compile_context>
chip_gen: v5e
topology: v5e:2x2
jax: 0.10.0
libtpu: 0.0.40
codegen_flags: <defaults>
</compile_context>

<pallas_src>
import functools

import jax
import jax.numpy as jnp
import numpy as np
from jax.experimental import pallas as pl
from jax.experimental.pallas import tpu as pltpu


def _ln_rowwise_kernel(x_ref, g_ref, b_ref, o_ref, *, eps, n):
    """LayerNorm over the last dim of a (tr, N) tile (N already lane-dense)."""
    x = x_ref[...].astype(jnp.float32)                       # (tr, N)
    n_inv = 1.0 / n
    mu = jnp.sum(x, axis=-1, keepdims=True) * n_inv          # (tr, 1)
    xc = x - mu
    var = jnp.sum(xc * xc, axis=-1, keepdims=True) * n_inv   # biased variance
    inv = jax.lax.rsqrt(var + eps)                           # EUP rsqrt
    y = xc * inv * g_ref[...] + b_ref[...]                   # affine (gamma, beta)
    o_ref[...] = y.astype(o_ref.dtype)


def _ln_packed_kernel(x_ref, g_ref, b_ref, s_ref, st_ref, o_ref, *, eps, n):
    """LayerNorm with g = Nw // n logical rows packed per physical row.

    The x tile is (tr, Nw) with Nw = g * n (lane-dense).  Segment sums and the
    broadcast back to full width are done on the otherwise-idle MXU against a
    block-diagonal ones matrix S (Nw, g) and its transpose ST (g, Nw), so no
    in-kernel reshape/relayout is needed and every VPU op and the store stay
    lane-dense.
    """
    x = x_ref[...].astype(jnp.float32)                       # (tr, Nw)
    s = s_ref[...]                                           # (Nw, g)
    st = st_ref[...]                                         # (g, Nw)
    n_inv = 1.0 / n
    mu = jnp.dot(x, s, preferred_element_type=jnp.float32) * n_inv        # (tr, g)
    mu_b = jnp.dot(mu, st, preferred_element_type=jnp.float32)            # (tr, Nw)
    xc = x - mu_b
    var = jnp.dot(xc * xc, s, preferred_element_type=jnp.float32) * n_inv  # (tr, g)
    inv = jax.lax.rsqrt(var + eps)
    inv_b = jnp.dot(inv, st, preferred_element_type=jnp.float32)          # (tr, Nw)
    y = xc * inv_b * g_ref[...] + b_ref[...]
    o_ref[...] = y.astype(o_ref.dtype)


def _pick_row_tile(rows, row_bytes, sublane):
    """Rows per grid step.

    Big enough to amortize per-step overhead, small enough that the 2x
    double-buffered input + output blocks stay under ~24 MiB of VMEM, and
    (when possible) leaving >= 2 grid steps so both v7x TensorCores get work.
    """
    if rows <= sublane:
        return rows                                   # single full-extent block
    budget_rows = max(sublane, (24 << 20) // (4 * row_bytes))
    cap_rows = max(sublane, rows // 2)                # keep >= 2 grid steps
    tr = min(budget_rows, cap_rows, rows)
    tr = max(sublane, (tr // sublane) * sublane)
    # Prefer a tile that divides the row count exactly (no partial last block),
    # but do not shrink by more than ~2x looking for one.
    t = tr
    while t > max(sublane, tr // 2) and rows % t != 0:
        t -= sublane
    if rows % t == 0:
        return t
    return tr                                         # partial last block (masked writes)


def layer_norm_pallas(x, gamma, beta, *, eps=1e-5):
    """x: (..., N); gamma/beta: (N,). LayerNorm over the last axis."""
    orig_shape = x.shape
    N = orig_shape[-1]
    R = int(np.prod(orig_shape[:-1]))
    itemsize = jnp.dtype(x.dtype).itemsize
    sublane = max(8, 32 // itemsize)                  # f32: 8, bf16: 16, int8/fp8: 32

    # Lane-density packing: fold g = 128 // N logical rows into each physical
    # row via a free row-major reshape, so the out_spec last dim is 128-wide.
    g = 1
    if N < 128 and 128 % N == 0 and R % (128 // N) == 0:
        g = 128 // N
    Rw, Nw = R // g, g * N

    x2 = x.reshape(Rw, Nw)                            # free reshape, no transpose, no pad
    g2 = jnp.tile(gamma.astype(jnp.float32), g).reshape(1, Nw)
    b2 = jnp.tile(beta.astype(jnp.float32), g).reshape(1, Nw)

    tr = _pick_row_tile(Rw, Nw * itemsize, sublane)
    grid = pl.cdiv(Rw, tr)

    bcast = lambda i: (0, 0)
    row_spec = pl.BlockSpec((tr, Nw), lambda i: (i, 0))
    in_specs = [row_spec,
                pl.BlockSpec((1, Nw), bcast),          # gamma (broadcast)
                pl.BlockSpec((1, Nw), bcast)]          # beta  (broadcast)
    inputs = [x2, g2, b2]

    if g == 1:
        kernel = functools.partial(_ln_rowwise_kernel, eps=eps, n=N)
    else:
        seg = (jnp.arange(Nw, dtype=jnp.int32)[:, None] // N
               == jnp.arange(g, dtype=jnp.int32)[None, :])
        s_mat = seg.astype(jnp.float32)                # (Nw, g) block-diagonal ones
        in_specs += [pl.BlockSpec((Nw, g), bcast),     # S
                     pl.BlockSpec((g, Nw), bcast)]     # S.T
        inputs += [s_mat, s_mat.T]
        kernel = functools.partial(_ln_packed_kernel, eps=eps, n=N)

    cost = pl.CostEstimate(
        flops=8 * R * N,
        transcendentals=R,
        bytes_accessed=2 * R * N * itemsize + 2 * Nw * 4,
    )

    y2 = pl.pallas_call(
        kernel,
        out_shape=jax.ShapeDtypeStruct((Rw, Nw), x.dtype),
        grid_spec=pltpu.PrefetchScalarGridSpec(
            num_scalar_prefetch=0,
            grid=(grid,),
            in_specs=in_specs,
            out_specs=row_spec,
        ),
        compiler_params=pltpu.CompilerParams(
            dimension_semantics=("parallel",),
            vmem_limit_bytes=40 << 20,                 # above scoped defaults, safe on v7x
        ),
        cost_estimate=cost,
    )(*inputs)

    return y2.reshape(orig_shape)


def layer_norm_ref(x, gamma, beta, eps=1e-5):
    """Pure-JAX reference matching torch.nn.LayerNorm over the last dim."""
    x32 = x.astype(jnp.float32)
    mu = jnp.mean(x32, axis=-1, keepdims=True)
    var = jnp.mean((x32 - mu) ** 2, axis=-1, keepdims=True)
    y = (x32 - mu) * jax.lax.rsqrt(var + eps) * gamma + beta
    return y.astype(x.dtype)


if __name__ == "__main__":
    # Small shapes consistent with the module: x is (B, M, D, N), LayerNorm over N.
    B, M, D, N = 2, 4, 16, 16

    key = jax.random.PRNGKey(0)
    kx, kg, kb = jax.random.split(key, 3)
    x = jax.random.normal(kx, (B, M, D, N), jnp.float32)
    gamma = 1.0 + 0.1 * jax.random.normal(kg, (N,), jnp.float32)
    beta = 0.1 * jax.random.normal(kb, (N,), jnp.float32)

    # NOTE: the module's eps=1e-6 is not forwarded to nn.LayerNorm -> default 1e-5.
    y = layer_norm_pallas(x, gamma, beta, eps=1e-5)
    y = jax.block_until_ready(y)

    y_ref = layer_norm_ref(x, gamma, beta, eps=1e-5)
    assert y.shape == (B, M, D, N)
    np.testing.assert_allclose(np.asarray(y), np.asarray(y_ref),
                               rtol=1e-5, atol=1e-5)
    print("KERNEL_OK")
</pallas_src>

<mosaic_0001>
module attributes {stable_mosaic.version = 11 : i64} {
  func.func @_ln_packed_kernel(%arg0: i32, %arg1: memref<8x128xf32, #tpu.memory_space<vmem>>, %arg2: memref<1x128xf32, #tpu.memory_space<vmem>>, %arg3: memref<1x128xf32, #tpu.memory_space<vmem>>, %arg4: memref<128x8xf32, #tpu.memory_space<vmem>>, %arg5: memref<8x128xf32, #tpu.memory_space<vmem>>, %arg6: memref<8x128xf32, #tpu.memory_space<vmem>>) attributes {dimension_semantics = [#tpu.dimension_semantics<parallel>], iteration_bounds = array<i64: 2>, scalar_prefetch = 0 : i64, scratch_operands = 0 : i64, tpu.core_type = #tpu.core_type<tc>, window_params = [{transform_indices = @transform_0, window_bounds = array<i64: 8, 128>}, {pipeline_mode = #tpu.pipeline_mode<synchronous>, transform_indices = @transform_1, window_bounds = array<i64: 1, 128>}, {pipeline_mode = #tpu.pipeline_mode<synchronous>, transform_indices = @transform_2, window_bounds = array<i64: 1, 128>}, {pipeline_mode = #tpu.pipeline_mode<synchronous>, transform_indices = @transform_3, window_bounds = array<i64: 128, 8>}, {pipeline_mode = #tpu.pipeline_mode<synchronous>, transform_indices = @transform_4, window_bounds = array<i64: 8, 128>}, {transform_indices = @transform_5, window_bounds = array<i64: 8, 128>}]} {
    %c0 = arith.constant 0 : index
    %c0_0 = arith.constant 0 : index
    %0 = vector.load %arg1[%c0, %c0_0] : memref<8x128xf32, #tpu.memory_space<vmem>>, vector<8x128xf32>
    %c0_1 = arith.constant 0 : index
    %c0_2 = arith.constant 0 : index
    %1 = vector.load %arg4[%c0_1, %c0_2] : memref<128x8xf32, #tpu.memory_space<vmem>>, vector<128x8xf32>
    %c0_3 = arith.constant 0 : index
    %c0_4 = arith.constant 0 : index
    %2 = vector.load %arg5[%c0_3, %c0_4] : memref<8x128xf32, #tpu.memory_space<vmem>>, vector<8x128xf32>
    %cst = arith.constant dense<0.000000e+00> : vector<8x8xf32>
    %3 = tpu.matmul %0, %1, %cst {dimension_numbers = #tpu.dot_dimension_numbers<[1], [0], [0], [1], [0, 0, 1, 1], [], []>} : vector<8x128xf32>, vector<128x8xf32>, vector<8x8xf32> -> vector<8x8xf32>
    %cst_5 = arith.constant 6.250000e-02 : f32
    %4 = vector.broadcast %cst_5 : f32 to vector<8x8xf32>
    %5 = arith.mulf %3, %4 : vector<8x8xf32>
    %cst_6 = arith.constant dense<0.000000e+00> : vector<8x128xf32>
    %6 = tpu.matmul %5, %2, %cst_6 {dimension_numbers = #tpu.dot_dimension_numbers<[1], [0], [0], [1], [0, 0, 1, 1], [], []>} : vector<8x8xf32>, vector<8x128xf32>, vector<8x128xf32> -> vector<8x128xf32>
    %7 = arith.subf %0, %6 : vector<8x128xf32>
    %8 = arith.mulf %7, %7 : vector<8x128xf32>
    %cst_7 = arith.constant dense<0.000000e+00> : vector<8x8xf32>
    %9 = tpu.matmul %8, %1, %cst_7 {dimension_numbers = #tpu.dot_dimension_numbers<[1], [0], [0], [1], [0, 0, 1, 1], [], []>} : vector<8x128xf32>, vector<128x8xf32>, vector<8x8xf32> -> vector<8x8xf32>
    %cst_8 = arith.constant 6.250000e-02 : f32
    %10 = vector.broadcast %cst_8 : f32 to vector<8x8xf32>
    %11 = arith.mulf %9, %10 : vector<8x8xf32>
    %cst_9 = arith.constant 9.99999974E-6 : f32
    %12 = vector.broadcast %cst_9 : f32 to vector<8x8xf32>
    %13 = arith.addf %11, %12 : vector<8x8xf32>
    %14 = math.rsqrt %13 : vector<8x8xf32>
    %cst_10 = arith.constant dense<0.000000e+00> : vector<8x128xf32>
    %15 = tpu.matmul %14, %2, %cst_10 {dimension_numbers = #tpu.dot_dimension_numbers<[1], [0], [0], [1], [0, 0, 1, 1], [], []>} : vector<8x8xf32>, vector<8x128xf32>, vector<8x128xf32> -> vector<8x128xf32>
    %16 = arith.mulf %7, %15 : vector<8x128xf32>
    %c0_11 = arith.constant 0 : index
    %c0_12 = arith.constant 0 : index
    %17 = vector.load %arg2[%c0_11, %c0_12] : memref<1x128xf32, #tpu.memory_space<vmem>>, vector<1x128xf32>
    %18 = vector.broadcast %17 : vector<1x128xf32> to vector<8x128xf32>
    %19 = arith.mulf %16, %18 : vector<8x128xf32>
    %c0_13 = arith.constant 0 : index
    %c0_14 = arith.constant 0 : index
    %20 = vector.load %arg3[%c0_13, %c0_14] : memref<1x128xf32, #tpu.memory_space<vmem>>, vector<1x128xf32>
    %21 = vector.broadcast %20 : vector<1x128xf32> to vector<8x128xf32>
    %22 = arith.addf %19, %21 : vector<8x128xf32>
    %c0_15 = arith.constant 0 : index
    %c0_16 = arith.constant 0 : index
    %23 = vector.load %arg6[%c0_15, %c0_16] : memref<8x128xf32, #tpu.memory_space<vmem>>, vector<8x128xf32>
    tpu.vector_store %arg6[%c0_15, %c0_16], %22 {strides = array<i32>} : memref<8x128xf32, #tpu.memory_space<vmem>>, vector<8x128xf32>,
    return
  }
  func.func @transform_0(%arg0: i32) -> (i32, i32) {
    %c0_i32 = arith.constant 0 : i32
    %c0_i32_0 = arith.constant 0 : i32
    return %arg0, %c0_i32 : i32, i32
  }
  func.func @transform_1(%arg0: i32) -> (i32, i32) {
    %c0_i32 = arith.constant 0 : i32
    %c0_i32_0 = arith.constant 0 : i32
    %c0_i32_1 = arith.constant 0 : i32
    return %c0_i32, %c0_i32_0 : i32, i32
  }
  func.func @transform_2(%arg0: i32) -> (i32, i32) {
    %c0_i32 = arith.constant 0 : i32
    %c0_i32_0 = arith.constant 0 : i32
    %c0_i32_1 = arith.constant 0 : i32
    return %c0_i32, %c0_i32_0 : i32, i32
  }
  func.func @transform_3(%arg0: i32) -> (i32, i32) {
    %c0_i32 = arith.constant 0 : i32
    %c0_i32_0 = arith.constant 0 : i32
    %c0_i32_1 = arith.constant 0 : i32
    return %c0_i32, %c0_i32_0 : i32, i32
  }
  func.func @transform_4(%arg0: i32) -> (i32, i32) {
    %c0_i32 = arith.constant 0 : i32
    %c0_i32_0 = arith.constant 0 : i32
    %c0_i32_1 = arith.constant 0 : i32
    return %c0_i32, %c0_i32_0 : i32, i32
  }
  func.func @transform_5(%arg0: i32) -> (i32, i32) {
    %c0_i32 = arith.constant 0 : i32
    %c0_i32_0 = arith.constant 0 : i32
    return %arg0, %c0_i32 : i32, i32
  }
}

</mosaic_0001>

<bundles_post_ra>
// kernel: tpu_custom_call.1
= control target key start
LH: loop header
LB: loop body
LE: loop exit
PB: predicated region body
PF: predicated region fallthrough
CT: control target
= control target key end

     0   :  { %10 = vsyncpa [#allocation3], 0  ;;  %s720_s0 = inlined_call_operand.vmem [shape: f32[16,128], index: 0, kind: input, shape index: {}]   ;;  %s721_s1 = inlined_call_operand.vmem [shape: f32[1,128], index: 1, kind: input, shape index: {}]   ;;  %s722_s2 = inlined_call_operand.vmem [shape: f32[1,128], index: 2, kind: input, shape index: {}]   ;;  %s723_s3 = inlined_call_operand.vmem [shape: f32[128,8], index: 3, kind: input, shape index: {}]   ;;  %s724_s4 = inlined_call_operand.vmem [shape: f32[8,128], index: 4, kind: input, shape index: {}]   ;;  %s725_s5 = inlined_call_operand.hbm [shape: f32[16,128], index: 5, kind: output, shape index: {}]  }
   0x1   :  { %12 = vsyncpa [#allocation3 + $0x1], 0  ;;  %s576_s18 = smov 0   ;;  %s578_s19 = smov 0  }
   0x2   :  { %s580_s20 = smov 0   ;;  %s582_s21 = smov 0  }
   0x3 LB: > { %s597_s22 = sadd.s32 4294967295, %s544_s21   ;;  %s427_s23 = sadd.s32 4294967294, %s544_s21   ;;  %s544_s21 = sphi %s582_s21, %s731_s21   ;;  %s540_s20 = sphi %s580_s20, %s730_s20   ;;  %s536_s19 = sphi %s578_s19, %s729_s19   ;;  %s532_s18 = sphi %s576_s18, %s728_s18  }
   0x4   : > { %s601_s24 = sadd.s32 1, %s544_s21   ;;  %s135_s25 = sadd.s32 1, %s540_s20 }
   0x5   : > { %s132_s26 = ssub.s32 %s544_s21, %s601_s24  ;;  %p145_p0 = scmp.ne.s32.totalorder %s540_s20, %s536_s19 }
   0x6   : > { %p133_p1 = scmp.eq.s32.totalorder %s132_s26, 0  ;;  %p146_p2 = scmp.eq.s32.totalorder %s597_s22, 1 }
   0x7   : > { %p151_p3 = scmp.ne.s32.totalorder %s536_s19, %s532_s18  ;;  %p152_p4 = scmp.eq.s32.totalorder %s427_s23, 1 }
   0x8   : > { %s612_s27 = scalar_select %p133_p1, %s540_s20, %s135_s25  }
   0x9   : > { %p614_p5 = por %p146_p2, %p145_p0  ;;  %p618_p6 = por %p152_p4, %p151_p3 }
   0xa   : > { %p430_p7 = scmp.ge.s32.totalorder %s544_s21, 1  ;;  %p189_p8 = scmp.lt.s32.totalorder %s544_s21, 3 }
   0xc   : > { %p190_p9 = pnand %p430_p7, %p189_p8 }
   0xd   : > { %p216_p10 = scmp.lt.s32.totalorder (!%p190_p9), %s597_s22, 1  ;;  %s213_s12 = sand.u32 (!%p190_p9), 1, %s536_s19  }
   0xe   : > { %193 = sbr.rel (%p190_p9) target bundleno = 604 (0x25c), region = 40  ;;  %s431_s13 = sshll.u32 (!%p190_p9), %s213_s12, 3 }
   0xf   : > { %s436_s14 = sshll.u32 (!%p190_p9), %s597_s22, 3  ;;  %s215_s6 = scalar_lea.vmem (!%p190_p9), [#allocation2], %s431_s13 }
  0x10   : > { %s363_s25 = scalar_lea.hbm (!%p190_p9), %s725_s5, %s436_s14  ;;  %s502_s15 = scalar_lea.hbm (!%p190_p9), %s725_s5, 16 }
  0x11   : > { %s367_s8 = sshll.u32 (!%p190_p9), %s363_s25, 4  ;;  %s368_s8 = int_to_ptr.hbm [resolvable:$true] %s367_s8 }
  0x12   : > { %s496_s9 = sshra.s32 (!%p190_p9), %s368_s8, 4  ;;  %s497_s9 = int_to_ptr.hbm [resolvable:$true] %s496_s9 }
  0x13   : > { %v236_v0 = vld [vmem:[%s723_s3 + $0x78] sm:$0xff]  ;;  %v235_v1 = vld [vmem:[%s723_s3 + $0x70] sm:$0xff]  ;;  %v234_v2 = vld [vmem:[%s723_s3 + $0x68] sm:$0xff]  ;;  %s217_s11 = scalar_select %p216_p10, %s597_s22, 1  ;;  %vm259_vm0 = vcmask 64512  }
  0x14   : > { %238 = vmatpush.msra.mxu0 %v236_v0  ;;  %285 = vmatpush.msra.mxu2 %v236_v0  ;;  %v233_v3 = vld [vmem:[%s723_s3 + $0x60] sm:$0xff]  ;;  %v232_v4 = vld [vmem:[%s723_s3 + $0x58] sm:$0xff]  ;;  %v231_v5 = vld [vmem:[%s723_s3 + $0x50] sm:$0xff]  ;;  %s353_s22 = scalar_lea.sflag [#allocation3], %s213_s12  ;;  %s498_s10 = scalar_lea.hbm %s497_s9, 8 }
  0x15   : > { %v230_v6 = vld [vmem:[%s723_s3 + $0x48] sm:$0xff]  ;;  %v229_v7 = vld [vmem:[%s723_s3 + $0x40] sm:$0xff]  ;;  %v228_v8 = vld [vmem:[%s723_s3 + $0x38] sm:$0xff]  ;;  %s432_s16 = sshll.u32 %s217_s11, 3  ;;  %p499_p11 = scmp.ne.s32.totalorder %s497_s9, %s498_s10 }
  0x16   : > { %239 = vmatpush.msra.mxu0 %v235_v1  ;;  %286 = vmatpush.msra.mxu2 %v235_v1  ;;  %v227_v9 = vld [vmem:[%s723_s3 + $0x30] sm:$0xff]  ;;  %v226_v10 = vld [vmem:[%s723_s3 + $0x28] sm:$0xff]  ;;  %v225_v11 = vld [vmem:[%s723_s3 + $0x20] sm:$0xff]  ;;  %s219_s7 = scalar_lea.vmem %s720_s0, %s432_s16  ;;  %p503_p0 = scmp.lt.s32.totalorder %s497_s9, %s725_s5 }
  0x17   : > { %v224_v12 = vld [vmem:[%s723_s3 + $0x18] sm:$0xff]  ;;  %v223_v13 = vld [vmem:[%s723_s3 + $0x10] sm:$0xff]  ;;  %v222_v14 = vld [vmem:[%s723_s3 + $0x8] sm:$0xff]  ;;  %p500_p12 = pnand %p499_p11, %p614_p5  ;;  %p504_p1 = scmp.lt.s32.totalorder %s502_s15, %s498_s10 }
  0x18   : > { %240 = vmatpush.msra.mxu0 %v234_v2  ;;  %287 = vmatpush.msra.mxu2 %v234_v2  ;;  %v221_v15 = vld [vmem:[%s723_s3] sm:$0xff] }
  0x19   : > { %v220_v16 = vld [vmem:[%s219_s7] sm:$0xff]  ;;  %s365_s7 = sshll.u32 %s215_s6, 4  ;;  %p501_p13 = pneg %p500_p12  ;;  %s366_s7 = int_to_ptr.vmem [resolvable:$true] %s365_s7 }
  0x1a   : > { %241 = vmatpush.msra.mxu0 %v233_v3  ;;  %288 = vmatpush.msra.mxu2 %v233_v3  ;;  %v237_v17 = vld [vmem:[%s724_s4] sm:$0xff]  ;;  %p505_p2 = por %p504_p1, %p503_p0 }
  0x1b   : > { %278 = vmatpush.msra.mxu1 %v237_v17  ;;  %335 = vmatpush.msra.mxu3 %v237_v17  ;;  %v478_v33 = vld [vmem:[%s721_s1] ss:$0 sm:$0xff] }
  0x1c   : > { %242 = vmatpush.msra.mxu0 %v232_v4  ;;  %289 = vmatpush.msra.mxu2 %v232_v4  ;;  %v479_v36 = vld [vmem:[%s722_s2] ss:$0 sm:$0xff]  ;;  %p506_p3 = pnand %p505_p2, %p501_p13 }
  0x1e   : > { %243 = vmatpush.msra.mxu0 %v231_v5  ;;  %290 = vmatpush.msra.mxu2 %v231_v5 }
  0x20   : > { %244 = vmatpush.msra.mxu0 %v230_v6  ;;  %291 = vmatpush.msra.mxu2 %v230_v6 }
  0x22   : > { %245 = vmatpush.msra.mxu0 %v229_v7  ;;  %292 = vmatpush.msra.mxu2 %v229_v7 }
  0x24   : > { %246 = vmatpush.msra.mxu0 %v228_v8  ;;  %293 = vmatpush.msra.mxu2 %v228_v8 }
  0x26   : > { %247 = vmatpush.msra.mxu0 %v227_v9  ;;  %294 = vmatpush.msra.mxu2 %v227_v9 }
  0x28   : > { %248 = vmatpush.msra.mxu0 %v226_v10  ;;  %295 = vmatpush.msra.mxu2 %v226_v10 }
  0x2a   : > { %249 = vmatpush.msra.mxu0 %v225_v11  ;;  %296 = vmatpush.msra.mxu2 %v225_v11 }
  0x2c   : > { %250 = vmatpush.msra.mxu0 %v224_v12  ;;  %297 = vmatpush.msra.mxu2 %v224_v12 }
  0x2e   : > { %251 = vmatpush.msra.mxu0 %v223_v13  ;;  %298 = vmatpush.msra.mxu2 %v223_v13 }
  0x30   : > { %252 = vmatpush.msra.mxu0 %v222_v14  ;;  %299 = vmatpush.msra.mxu2 %v222_v14 }
  0x32   : > { %253 = vmatpush.msra.mxu0 %v221_v15  ;;  %300 = vmatpush.msra.mxu2 %v221_v15 }
  0x33   : > { %254 = vmatmul.f32.vlgmr.msra.gmra.mxu0 %v220_v16 }
  0xb0   : > { %v255_v18 = vpop.f32.mrf.mxu0 }
  0xb1   : > { %v258_v19 = vmul.f32 0.0625, %v255_v18 }
  0xb3   : > { %433 = vmatmul.msk.f32.vlgmr.msra.gmra.mxu1 %vm259_vm0, %v258_v19 }
 0x130   : > { %v280_v20 = vpop.f32.mrf.mxu1 }
 0x131   : > { %v283_v21 = vsub.f32 %v220_v16, %v280_v20 }
 0x133   : > { %v284_v22 = vmul.f32 %v283_v21, %v283_v21 }
 0x135   : > { %301 = vmatmul.f32.vlgmr.msra.gmra.mxu2 %v284_v22 }
 0x1b8   : > { %v302_v23 = vpop.f32.mrf.mxu2 }
 0x1b9   : > { %v305_v24 = vmul.f32 0.0625, %v302_v23 }
 0x1bb   : > { %v306_v25 = vadd.f32 1e-05, %v305_v24 }
 0x1bd   : > { %480 = vrsqrt.f32 %v306_v25  ;;  %vm313_vm2 = vweird.f32 %v306_v25 }
 0x1c3   : > { %v481_v26 = vpop.eup %480 }
 0x1c4   : > { %v308_v27 = vmul.f32 %v481_v26, %v306_v25  ;;  %vm314_vm1 = vweird.f32 %v481_v26 }
 0x1c5   : > { %vm315_vm3 = vmor %vm313_vm2, %vm314_vm1 }
 0x1c6   : > { %v309_v28 = vmul.f32 %v481_v26, %v308_v27 }
 0x1c8   : > { %v310_v29 = vmul.f32 0.5, %v309_v28 }
 0x1ca   : > { %v311_v30 = vsub.f32 1.5, %v310_v29 }
 0x1cc   : > { %v312_v31 = vmul.f32 %v481_v26, %v311_v30 }
 0x1ce   : > { %v316_v32 = vsel %vm315_vm3, %v481_v26, %v312_v31 }
 0x1cf   : > { %434 = vmatmul.msk.f32.vlgmr.msra.gmra.mxu3 %vm259_vm0, %v316_v32 }
 0x252   : > { %v337_v34 = vpop.f32.mrf.mxu3 }
 0x253   : > { %v340_v35 = vmul.f32 %v337_v34, %v283_v21 }
 0x255   : > { %v345_v37 = vmul.f32 %v478_v33, %v340_v35 }
 0x257   : > { %v350_v38 = vadd.f32 %v479_v36, %v345_v37 }
 0x259   : > { %351 = vst [vmem:[%s215_s6] sm:$0xff] %v350_v38 }
 0x25a   : > { %509 = shalt.err (!%p506_p3)
}
 0x25b   : > { %439 = dma.vmem_to_hbm [thread:$0]  (%p614_p5), %s366_s7, 128, %s368_s8, %s353_s22  }
 0x25c PF: > { %p445_p4 = scmp.ge.s32.totalorder %s544_s21, 2  ;;  %s379_s12 = sand.u32 1, %s532_s18  }
 0x25d   : > { %s380_s17 = scalar_lea.sflag [#allocation3], %s379_s12 }
 0x25e   : > { %p442_p7 = pnand %p445_p4, %p618_p6 }
 0x260   : > { %p443_p8 = pneg %p442_p7 }
 0x262   : > { %527 = dma.done.wait (%p443_p8), %s380_s17, 128  }
 0x263   : > { %529 = vsyncadd (%p443_p8), %s380_s17, 4294967168  ;;  %p15_p9 = scmp.ge.s32.totalorder %s601_s24, 4   ;;  %s728_s18 = smov %s536_s19 }
 0x264   : > { %s729_s19 = smov %s540_s20  ;;  %s730_s20 = smov %s612_s27 }
 0x265   : > { %s731_s21 = smov %s601_s24  ;;  %17 = sbr.rel (!%p15_p9) target bundleno = 3 (0x3), region = 75 }
 0x26a   :  { %386 = vsyncpa [#allocation3], 1 }
 0x26b   :  { %388 = vsyncpa [#allocation3 + $0x1], 1 }

</bundles_post_ra>
